<compile_context>
chip_gen: v6e
topology: v6e:2x2x1
jax: 0.10.0
libtpu: 0.0.40
codegen_flags: <defaults>
</compile_context>

<pallas_src>
import functools

import jax
import jax.numpy as jnp
from jax.experimental import pallas as pl
from jax.experimental.pallas import tpu as pltpu

KH = KW = 3  # kernel_size=3, stride=1, padding=1


def up_kernel(x_ref, w1_ref, b1_ref, w2_ref, b2_ref, col_ref, o_ref,
              xz_ref, yz_ref, p1_ref, p2_ref, *, H, W, LPAD):
    """Fused conv3x3 -> ReLU -> conv3x3 -> Tanh for Nb batch elements.

    x_ref  : (Nb, Cin, L)      f32, channel-major, L = H*W on lanes
    w1_ref : (Cmid, 9*Cin)     bf16, im2col-flattened, columns ordered (ky,kx,cin)
    b1_ref : (Cmid, 1)         f32
    w2_ref : (Cout, 9*Cmid)    bf16
    b2_ref : (Cout, 1)         f32
    col_ref: (1, L)            int32 lane -> image-column index (p % W)
    o_ref  : (Nb, Cout, L)     f32
    xz_ref : (Cin,  2*LPAD+L)  f32 staging buffer (image lives at lane LPAD)
    yz_ref : (Cmid, 2*LPAD+L)  f32 staging buffer
    p1_ref : (9*Cin,  L)       bf16/f32 im2col patch scratch (conv1)
    p2_ref : (9*Cmid, L)       bf16/f32 im2col patch scratch (conv2)
    """
    Nb = x_ref.shape[0]
    Cin = x_ref.shape[1]
    Cmid = yz_ref.shape[0]
    L = H * W
    base = LPAD - (W + 1)   # lane offset of tap (ky=0, kx=0)

    # Boundary-validity masks, computed once and shared by both convs and all
    # Nb elements.  Out-of-image tap lanes are select-masked to zero, so the
    # staging buffers never need zero-filling (and NaN-garbage in the pads is
    # harmless because we select, not multiply).
    pos = jax.lax.broadcasted_iota(jnp.int32, (1, L), 1)
    col = col_ref[...]
    row_ok = (pos >= W, None, pos < L - W)      # dy = -1, 0, +1
    col_ok = (col >= 1, None, col <= W - 2)     # dx = -1, 0, +1

    def build_patch(z_ref, p_ref, C):
        # z_ref holds the image at lanes [LPAD, LPAD+L); pad lanes may hold
        # garbage -- any lane that would read outside the image is masked.
        for ky in range(KH):
            for kx in range(KW):
                t = ky * KW + kx
                tap = z_ref[:, pl.ds(base + ky * W + kx, L)]      # (C, L) f32
                m = row_ok[ky]
                if col_ok[kx] is not None:
                    m = col_ok[kx] if m is None else jnp.logical_and(m, col_ok[kx])
                if m is not None:
                    tap = jnp.where(m, tap, 0.0)
                p_ref[pl.ds(t * C, C), :] = tap.astype(p_ref.dtype)

    # Hoist the (tiny) weight / bias loads out of the batch loop.
    w1 = w1_ref[...]
    b1 = b1_ref[...]
    w2 = w2_ref[...]
    b2 = b2_ref[...]

    for nb in range(Nb):
        # ---- conv1 + bias + ReLU ----------------------------------------
        xz_ref[:, pl.ds(LPAD, L)] = x_ref[nb]            # lane-aligned store
        build_patch(xz_ref, p1_ref, Cin)
        y1 = jnp.dot(w1, p1_ref[...].astype(jnp.bfloat16),
                     preferred_element_type=jnp.float32)
        y1 = jnp.maximum(y1 + b1, 0.0)                    # (Cmid, L) f32

        # ---- conv2 + bias + Tanh (intermediate stays in VMEM) ------------
        yz_ref[:, pl.ds(LPAD, L)] = y1                    # lane-aligned store
        build_patch(yz_ref, p2_ref, Cmid)
        y2 = jnp.dot(w2, p2_ref[...].astype(jnp.bfloat16),
                     preferred_element_type=jnp.float32)
        o_ref[nb] = jnp.tanh(y2 + b2).astype(o_ref.dtype)


def up_forward(x_nchw, w1_oihw, b1, w2_oihw, b2):
    """Tanh(conv2(ReLU(conv1(x) + b1)) + b2), matching PyTorch Up.forward.

    x: (N, Cin, H, W); w1: (Cmid, Cin, 3, 3); w2: (Cout, Cmid, 3, 3).
    """
    N, Cin, H, W = x_nchw.shape
    Cmid = w1_oihw.shape[0]
    Cout = w2_oihw.shape[0]
    L = H * W
    LPAD = ((W + 1 + 127) // 128) * 128     # 128-aligned pad (>= W + 1)
    PADW = 2 * LPAD + L                     # staging-buffer lane width

    # Metadata-only reshape: channel-major, H*W on lanes.
    x_flat = x_nchw.reshape(N, Cin, L)

    # im2col weights, cast once to bf16 (MXU operands); biases stay f32.
    w1_2d = jnp.transpose(w1_oihw, (0, 2, 3, 1)).reshape(Cmid, KH * KW * Cin)
    w2_2d = jnp.transpose(w2_oihw, (0, 2, 3, 1)).reshape(Cout, KH * KW * Cmid)
    w1_2d = w1_2d.astype(jnp.bfloat16)
    w2_2d = w2_2d.astype(jnp.bfloat16)
    b1_c = b1.reshape(Cmid, 1).astype(jnp.float32)
    b2_c = b2.reshape(Cout, 1).astype(jnp.float32)

    # Tiny int32 lane -> image-column index (avoids a vectorized integer mod
    # in-kernel for non-power-of-two W); row masks come from an in-kernel iota.
    col = (jnp.arange(L, dtype=jnp.int32) % W).reshape(1, L)

    # Batch elements per grid step: merge steps (per-step compute at small L
    # is dominated by the ~0.35us fixed grid-step cost) but keep the grid >= 2
    # when possible so v7x's two TensorCores still split the work.
    if N % 2 == 0:
        ngrid, Nb = 2, N // 2
    else:
        ngrid, Nb = N, 1
    # TODO(synk): for very large N, cap Nb to bound the per-step I/O block.

    # Patch scratch in bf16 only when the channel count lines up with bf16
    # sublane packing (16 rows / tile) so every tap store is tile-aligned;
    # otherwise keep f32 and cast at the matmul-operand read.
    p1_dt = jnp.bfloat16 if Cin % 16 == 0 else jnp.float32
    p2_dt = jnp.bfloat16 if Cmid % 16 == 0 else jnp.float32

    # Scoped-VMEM request sized from the per-step footprint (default scoped
    # limit is 16 MiB on v5e / 32 MiB on v6e+), capped below v7x's 64 MiB.
    est = (4 * (Cin + Cmid) * PADW
           + KH * KW * Cin * L * jnp.dtype(p1_dt).itemsize
           + KH * KW * Cmid * L * jnp.dtype(p2_dt).itemsize
           + 2 * 4 * Nb * (Cin + Cout) * L               # double-buffered I/O
           + 2 * KH * KW * (Cmid * Cin + Cout * Cmid)    # bf16 weights
           + 4 * (L + Cmid + Cout))
    vmem_limit = int(min(max(4 * est, 32 * 2 ** 20), 48 * 2 ** 20))

    kernel = functools.partial(up_kernel, H=H, W=W, LPAD=LPAD)

    out_flat = pl.pallas_call(
        kernel,
        out_shape=jax.ShapeDtypeStruct((N, Cout, L), x_nchw.dtype),
        grid_spec=pltpu.PrefetchScalarGridSpec(
            num_scalar_prefetch=0,
            grid=(ngrid,),
            in_specs=[
                pl.BlockSpec((Nb, Cin, L), lambda n: (n, 0, 0)),
                pl.BlockSpec((Cmid, KH * KW * Cin), lambda n: (0, 0)),
                pl.BlockSpec((Cmid, 1), lambda n: (0, 0)),
                pl.BlockSpec((Cout, KH * KW * Cmid), lambda n: (0, 0)),
                pl.BlockSpec((Cout, 1), lambda n: (0, 0)),
                pl.BlockSpec((1, L), lambda n: (0, 0)),
            ],
            out_specs=pl.BlockSpec((Nb, Cout, L), lambda n: (n, 0, 0)),
            scratch_shapes=[
                pltpu.VMEM((Cin, PADW), jnp.float32),
                pltpu.VMEM((Cmid, PADW), jnp.float32),
                pltpu.VMEM((KH * KW * Cin, L), p1_dt),
                pltpu.VMEM((KH * KW * Cmid, L), p2_dt),
            ],
        ),
        compiler_params=pltpu.CompilerParams(
            dimension_semantics=("parallel",),
            vmem_limit_bytes=vmem_limit),
    )(x_flat, w1_2d, b1_c, w2_2d, b2_c, col)

    return out_flat.reshape(N, Cout, H, W)


if __name__ == "__main__":
    key = jax.random.PRNGKey(0)
    k_x, k_w1, k_b1, k_w2, k_b2 = jax.random.split(key, 5)

    # Up(inc, outc): Conv2d(inc, inc//2) -> ReLU -> Conv2d(inc//2, outc) -> Tanh
    N, inc, outc, H, W = 2, 16, 8, 16, 16
    mid = inc // 2

    x = jax.random.normal(k_x, (N, inc, H, W), dtype=jnp.float32)
    w1 = jax.random.normal(k_w1, (mid, inc, KH, KW), dtype=jnp.float32) * 0.1
    b1 = jax.random.normal(k_b1, (mid,), dtype=jnp.float32) * 0.1
    w2 = jax.random.normal(k_w2, (outc, mid, KH, KW), dtype=jnp.float32) * 0.1
    b2 = jax.random.normal(k_b2, (outc,), dtype=jnp.float32) * 0.1

    out = jax.jit(up_forward)(x, w1, b1, w2, b2)
    out = jax.block_until_ready(out)

    # Reference: full-f32 XLA conv -> +bias -> ReLU -> conv -> +bias -> Tanh.
    def conv(v, w):
        return jax.lax.conv_general_dilated(
            v, w, window_strides=(1, 1), padding=((1, 1), (1, 1)),
            dimension_numbers=("NCHW", "OIHW", "NCHW"))

    ref = jnp.maximum(conv(x, w1) + b1.reshape(1, mid, 1, 1), 0.0)
    ref = jnp.tanh(conv(ref, w2) + b2.reshape(1, outc, 1, 1))

    assert out.shape == (N, outc, H, W)
    err = float(jnp.max(jnp.abs(out - ref)))
    # bf16 MXU operands (f32 accumulation) vs. the all-f32 reference.
    assert err < 5e-2, f"max abs error {err}"
    print("KERNEL_OK")
</pallas_src>

<mosaic_0001>
module attributes {stable_mosaic.version = 11 : i64} {
  func.func @up_kernel(%arg0: i32, %arg1: memref<1x16x256xf32, #tpu.memory_space<vmem>>, %arg2: memref<8x144xbf16, #tpu.memory_space<vmem>>, %arg3: memref<8x1xf32, #tpu.memory_space<vmem>>, %arg4: memref<8x72xbf16, #tpu.memory_space<vmem>>, %arg5: memref<8x1xf32, #tpu.memory_space<vmem>>, %arg6: memref<1x256xi32, #tpu.memory_space<vmem>>, %arg7: memref<1x8x256xf32, #tpu.memory_space<vmem>>, %arg8: memref<16x512xf32, #tpu.memory_space<vmem>>, %arg9: memref<8x512xf32, #tpu.memory_space<vmem>>, %arg10: memref<144x256xbf16, #tpu.memory_space<vmem>>, %arg11: memref<72x256xf32, #tpu.memory_space<vmem>>) attributes {dimension_semantics = [#tpu.dimension_semantics<parallel>], iteration_bounds = array<i64: 2>, scalar_prefetch = 0 : i64, scratch_operands = 4 : i64, tpu.core_type = #tpu.core_type<tc>, window_params = [{transform_indices = @transform_0, window_bounds = array<i64: 1, 16, 256>}, {pipeline_mode = #tpu.pipeline_mode<synchronous>, transform_indices = @transform_1, window_bounds = array<i64: 8, 144>}, {pipeline_mode = #tpu.pipeline_mode<synchronous>, transform_indices = @transform_2, window_bounds = array<i64: 8, 1>}, {pipeline_mode = #tpu.pipeline_mode<synchronous>, transform_indices = @transform_3, window_bounds = array<i64: 8, 72>}, {pipeline_mode = #tpu.pipeline_mode<synchronous>, transform_indices = @transform_4, window_bounds = array<i64: 8, 1>}, {pipeline_mode = #tpu.pipeline_mode<synchronous>, transform_indices = @transform_5, window_bounds = array<i64: 1, 256>}, {transform_indices = @transform_6, window_bounds = array<i64: 1, 8, 256>}]} {
    %0 = tpu.iota {dimensions = array<i32: 1>} : vector<1x256xi32>
    %c0 = arith.constant 0 : index
    %c0_0 = arith.constant 0 : index
    %1 = vector.load %arg6[%c0, %c0_0] : memref<1x256xi32, #tpu.memory_space<vmem>>, vector<1x256xi32>
    %c16_i32 = arith.constant 16 : i32
    %2 = vector.broadcast %c16_i32 : i32 to vector<1x256xi32>
    %3 = arith.cmpi sge, %0, %2 : vector<1x256xi32>
    %c240_i32 = arith.constant 240 : i32
    %4 = vector.broadcast %c240_i32 : i32 to vector<1x256xi32>
    %5 = arith.cmpi slt, %0, %4 : vector<1x256xi32>
    %c1_i32 = arith.constant 1 : i32
    %6 = vector.broadcast %c1_i32 : i32 to vector<1x256xi32>
    %7 = arith.cmpi sge, %1, %6 : vector<1x256xi32>
    %c14_i32 = arith.constant 14 : i32
    %8 = vector.broadcast %c14_i32 : i32 to vector<1x256xi32>
    %9 = arith.cmpi sle, %1, %8 : vector<1x256xi32>
    %c0_1 = arith.constant 0 : index
    %c0_2 = arith.constant 0 : index
    %10 = vector.load %arg2[%c0_1, %c0_2] : memref<8x144xbf16, #tpu.memory_space<vmem>>, vector<8x144xbf16>
    %c0_3 = arith.constant 0 : index
    %c0_4 = arith.constant 0 : index
    %11 = vector.load %arg3[%c0_3, %c0_4] : memref<8x1xf32, #tpu.memory_space<vmem>>, vector<8x1xf32>
    %c0_5 = arith.constant 0 : index
    %c0_6 = arith.constant 0 : index
    %12 = vector.load %arg4[%c0_5, %c0_6] : memref<8x72xbf16, #tpu.memory_space<vmem>>, vector<8x72xbf16>
    %c0_7 = arith.constant 0 : index
    %c0_8 = arith.constant 0 : index
    %13 = vector.load %arg5[%c0_7, %c0_8] : memref<8x1xf32, #tpu.memory_space<vmem>>, vector<8x1xf32>
    %c0_9 = arith.constant 0 : index
    %c0_10 = arith.constant 0 : index
    %c0_11 = arith.constant 0 : index
    %14 = vector.load %arg1[%c0_9, %c0_10, %c0_11] : memref<1x16x256xf32, #tpu.memory_space<vmem>>, vector<1x16x256xf32>
    %15 = vector.shape_cast %14 : vector<1x16x256xf32> to vector<16x256xf32>
    %c0_12 = arith.constant 0 : index
    %c128 = arith.constant 128 : index
    %16 = vector.load %arg8[%c0_12, %c128] : memref<16x512xf32, #tpu.memory_space<vmem>>, vector<16x256xf32>
    tpu.vector_store %arg8[%c0_12, %c128], %15 {strides = array<i32>} : memref<16x512xf32, #tpu.memory_space<vmem>>, vector<16x256xf32>,
    %c0_13 = arith.constant 0 : index
    %c111 = arith.constant 111 : index
    %17 = vector.load %arg8[%c0_13, %c111] : memref<16x512xf32, #tpu.memory_space<vmem>>, vector<16x256xf32>
    %18 = arith.andi %3, %7 : vector<1x256xi1>
    %cst = arith.constant 0.000000e+00 : f32
    %19 = vector.shape_cast %18 : vector<1x256xi1> to vector<1x256xi1>
    %20 = vector.broadcast %19 : vector<1x256xi1> to vector<16x256xi1>
    %21 = vector.broadcast %cst : f32 to vector<16x256xf32>
    %22 = arith.select %20, %17, %21 : vector<16x256xi1>, vector<16x256xf32>
    %23 = arith.truncf %22 : vector<16x256xf32> to vector<16x256xbf16>
    %c0_14 = arith.constant 0 : index
    %c0_15 = arith.constant 0 : index
    %24 = vector.load %arg10[%c0_14, %c0_15] : memref<144x256xbf16, #tpu.memory_space<vmem>>, vector<16x256xbf16>
    tpu.vector_store %arg10[%c0_14, %c0_15], %23 {strides = array<i32>} : memref<144x256xbf16, #tpu.memory_space<vmem>>, vector<16x256xbf16>,
    %c0_16 = arith.constant 0 : index
    %c112 = arith.constant 112 : index
    %25 = vector.load %arg8[%c0_16, %c112] : memref<16x512xf32, #tpu.memory_space<vmem>>, vector<16x256xf32>
    %cst_17 = arith.constant 0.000000e+00 : f32
    %26 = vector.shape_cast %3 : vector<1x256xi1> to vector<1x256xi1>
    %27 = vector.broadcast %26 : vector<1x256xi1> to vector<16x256xi1>
    %28 = vector.broadcast %cst_17 : f32 to vector<16x256xf32>
    %29 = arith.select %27, %25, %28 : vector<16x256xi1>, vector<16x256xf32>
    %30 = arith.truncf %29 : vector<16x256xf32> to vector<16x256xbf16>
    %c16 = arith.constant 16 : index
    %c0_18 = arith.constant 0 : index
    %31 = vector.load %arg10[%c16, %c0_18] : memref<144x256xbf16, #tpu.memory_space<vmem>>, vector<16x256xbf16>
    tpu.vector_store %arg10[%c16, %c0_18], %30 {strides = array<i32>} : memref<144x256xbf16, #tpu.memory_space<vmem>>, vector<16x256xbf16>,
    %c0_19 = arith.constant 0 : index
    %c113 = arith.constant 113 : index
    %32 = vector.load %arg8[%c0_19, %c113] : memref<16x512xf32, #tpu.memory_space<vmem>>, vector<16x256xf32>
    %33 = arith.andi %3, %9 : vector<1x256xi1>
    %cst_20 = arith.constant 0.000000e+00 : f32
    %34 = vector.shape_cast %33 : vector<1x256xi1> to vector<1x256xi1>
    %35 = vector.broadcast %34 : vector<1x256xi1> to vector<16x256xi1>
    %36 = vector.broadcast %cst_20 : f32 to vector<16x256xf32>
    %37 = arith.select %35, %32, %36 : vector<16x256xi1>, vector<16x256xf32>
    %38 = arith.truncf %37 : vector<16x256xf32> to vector<16x256xbf16>
    %c32 = arith.constant 32 : index
    %c0_21 = arith.constant 0 : index
    %39 = vector.load %arg10[%c32, %c0_21] : memref<144x256xbf16, #tpu.memory_space<vmem>>, vector<16x256xbf16>
    tpu.vector_store %arg10[%c32, %c0_21], %38 {strides = array<i32>} : memref<144x256xbf16, #tpu.memory_space<vmem>>, vector<16x256xbf16>,
    %c0_22 = arith.constant 0 : index
    %c127 = arith.constant 127 : index
    %40 = vector.load %arg8[%c0_22, %c127] : memref<16x512xf32, #tpu.memory_space<vmem>>, vector<16x256xf32>
    %cst_23 = arith.constant 0.000000e+00 : f32
    %41 = vector.shape_cast %7 : vector<1x256xi1> to vector<1x256xi1>
    %42 = vector.broadcast %41 : vector<1x256xi1> to vector<16x256xi1>
    %43 = vector.broadcast %cst_23 : f32 to vector<16x256xf32>
    %44 = arith.select %42, %40, %43 : vector<16x256xi1>, vector<16x256xf32>
    %45 = arith.truncf %44 : vector<16x256xf32> to vector<16x256xbf16>
    %c48 = arith.constant 48 : index
    %c0_24 = arith.constant 0 : index
    %46 = vector.load %arg10[%c48, %c0_24] : memref<144x256xbf16, #tpu.memory_space<vmem>>, vector<16x256xbf16>
    tpu.vector_store %arg10[%c48, %c0_24], %45 {strides = array<i32>} : memref<144x256xbf16, #tpu.memory_space<vmem>>, vector<16x256xbf16>,
    %c0_25 = arith.constant 0 : index
    %c128_26 = arith.constant 128 : index
    %47 = vector.load %arg8[%c0_25, %c128_26] : memref<16x512xf32, #tpu.memory_space<vmem>>, vector<16x256xf32>
    %48 = arith.truncf %47 : vector<16x256xf32> to vector<16x256xbf16>
    %c64 = arith.constant 64 : index
    %c0_27 = arith.constant 0 : index
    %49 = vector.load %arg10[%c64, %c0_27] : memref<144x256xbf16, #tpu.memory_space<vmem>>, vector<16x256xbf16>
    tpu.vector_store %arg10[%c64, %c0_27], %48 {strides = array<i32>} : memref<144x256xbf16, #tpu.memory_space<vmem>>, vector<16x256xbf16>,
    %c0_28 = arith.constant 0 : index
    %c129 = arith.constant 129 : index
    %50 = vector.load %arg8[%c0_28, %c129] : memref<16x512xf32, #tpu.memory_space<vmem>>, vector<16x256xf32>
    %cst_29 = arith.constant 0.000000e+00 : f32
    %51 = vector.shape_cast %9 : vector<1x256xi1> to vector<1x256xi1>
    %52 = vector.broadcast %51 : vector<1x256xi1> to vector<16x256xi1>
    %53 = vector.broadcast %cst_29 : f32 to vector<16x256xf32>
    %54 = arith.select %52, %50, %53 : vector<16x256xi1>, vector<16x256xf32>
    %55 = arith.truncf %54 : vector<16x256xf32> to vector<16x256xbf16>
    %c80 = arith.constant 80 : index
    %c0_30 = arith.constant 0 : index
    %56 = vector.load %arg10[%c80, %c0_30] : memref<144x256xbf16, #tpu.memory_space<vmem>>, vector<16x256xbf16>
    tpu.vector_store %arg10[%c80, %c0_30], %55 {strides = array<i32>} : memref<144x256xbf16, #tpu.memory_space<vmem>>, vector<16x256xbf16>,
    %c0_31 = arith.constant 0 : index
    %c143 = arith.constant 143 : index
    %57 = vector.load %arg8[%c0_31, %c143] : memref<16x512xf32, #tpu.memory_space<vmem>>, vector<16x256xf32>
    %58 = arith.andi %5, %7 : vector<1x256xi1>
    %cst_32 = arith.constant 0.000000e+00 : f32
    %59 = vector.shape_cast %58 : vector<1x256xi1> to vector<1x256xi1>
    %60 = vector.broadcast %59 : vector<1x256xi1> to vector<16x256xi1>
    %61 = vector.broadcast %cst_32 : f32 to vector<16x256xf32>
    %62 = arith.select %60, %57, %61 : vector<16x256xi1>, vector<16x256xf32>
    %63 = arith.truncf %62 : vector<16x256xf32> to vector<16x256xbf16>
    %c96 = arith.constant 96 : index
    %c0_33 = arith.constant 0 : index
    %64 = vector.load %arg10[%c96, %c0_33] : memref<144x256xbf16, #tpu.memory_space<vmem>>, vector<16x256xbf16>
    tpu.vector_store %arg10[%c96, %c0_33], %63 {strides = array<i32>} : memref<144x256xbf16, #tpu.memory_space<vmem>>, vector<16x256xbf16>,
    %c0_34 = arith.constant 0 : index
    %c144 = arith.constant 144 : index
    %65 = vector.load %arg8[%c0_34, %c144] : memref<16x512xf32, #tpu.memory_space<vmem>>, vector<16x256xf32>
    %cst_35 = arith.constant 0.000000e+00 : f32
    %66 = vector.shape_cast %5 : vector<1x256xi1> to vector<1x256xi1>
    %67 = vector.broadcast %66 : vector<1x256xi1> to vector<16x256xi1>
    %68 = vector.broadcast %cst_35 : f32 to vector<16x256xf32>
    %69 = arith.select %67, %65, %68 : vector<16x256xi1>, vector<16x256xf32>
    %70 = arith.truncf %69 : vector<16x256xf32> to vector<16x256xbf16>
    %c112_36 = arith.constant 112 : index
    %c0_37 = arith.constant 0 : index
    %71 = vector.load %arg10[%c112_36, %c0_37] : memref<144x256xbf16, #tpu.memory_space<vmem>>, vector<16x256xbf16>
    tpu.vector_store %arg10[%c112_36, %c0_37], %70 {strides = array<i32>} : memref<144x256xbf16, #tpu.memory_space<vmem>>, vector<16x256xbf16>,
    %c0_38 = arith.constant 0 : index
    %c145 = arith.constant 145 : index
    %72 = vector.load %arg8[%c0_38, %c145] : memref<16x512xf32, #tpu.memory_space<vmem>>, vector<16x256xf32>
    %73 = arith.andi %5, %9 : vector<1x256xi1>
    %cst_39 = arith.constant 0.000000e+00 : f32
    %74 = vector.shape_cast %73 : vector<1x256xi1> to vector<1x256xi1>
    %75 = vector.broadcast %74 : vector<1x256xi1> to vector<16x256xi1>
    %76 = vector.broadcast %cst_39 : f32 to vector<16x256xf32>
    %77 = arith.select %75, %72, %76 : vector<16x256xi1>, vector<16x256xf32>
    %78 = arith.truncf %77 : vector<16x256xf32> to vector<16x256xbf16>
    %c128_40 = arith.constant 128 : index
    %c0_41 = arith.constant 0 : index
    %79 = vector.load %arg10[%c128_40, %c0_41] : memref<144x256xbf16, #tpu.memory_space<vmem>>, vector<16x256xbf16>
    tpu.vector_store %arg10[%c128_40, %c0_41], %78 {strides = array<i32>} : memref<144x256xbf16, #tpu.memory_space<vmem>>, vector<16x256xbf16>,
    %c0_42 = arith.constant 0 : index
    %c0_43 = arith.constant 0 : index
    %80 = vector.load %arg10[%c0_42, %c0_43] : memref<144x256xbf16, #tpu.memory_space<vmem>>, vector<144x256xbf16>
    %cst_44 = arith.constant dense<0.000000e+00> : vector<8x256xf32>
    %81 = tpu.matmul %10, %80, %cst_44 {dimension_numbers = #tpu.dot_dimension_numbers<[1], [0], [0], [1], [0, 0, 1, 1], [], []>} : vector<8x144xbf16>, vector<144x256xbf16>, vector<8x256xf32> -> vector<8x256xf32>
    %82 = vector.broadcast %11 : vector<8x1xf32> to vector<8x256xf32>
    %83 = arith.addf %81, %82 : vector<8x256xf32>
    %cst_45 = arith.constant 0.000000e+00 : f32
    %84 = vector.broadcast %cst_45 : f32 to vector<8x256xf32>
    %85 = arith.maximumf %83, %84 : vector<8x256xf32>
    %c0_46 = arith.constant 0 : index
    %c128_47 = arith.constant 128 : index
    %86 = vector.load %arg9[%c0_46, %c128_47] : memref<8x512xf32, #tpu.memory_space<vmem>>, vector<8x256xf32>
    tpu.vector_store %arg9[%c0_46, %c128_47], %85 {strides = array<i32>} : memref<8x512xf32, #tpu.memory_space<vmem>>, vector<8x256xf32>,
    %c0_48 = arith.constant 0 : index
    %c111_49 = arith.constant 111 : index
    %87 = vector.load %arg9[%c0_48, %c111_49] : memref<8x512xf32, #tpu.memory_space<vmem>>, vector<8x256xf32>
    %88 = arith.andi %3, %7 : vector<1x256xi1>
    %cst_50 = arith.constant 0.000000e+00 : f32
    %89 = vector.shape_cast %88 : vector<1x256xi1> to vector<1x256xi1>
    %90 = vector.broadcast %89 : vector<1x256xi1> to vector<8x256xi1>
    %91 = vector.broadcast %cst_50 : f32 to vector<8x256xf32>
    %92 = arith.select %90, %87, %91 : vector<8x256xi1>, vector<8x256xf32>
    %c0_51 = arith.constant 0 : index
    %c0_52 = arith.constant 0 : index
    %93 = vector.load %arg11[%c0_51, %c0_52] : memref<72x256xf32, #tpu.memory_space<vmem>>, vector<8x256xf32>
    tpu.vector_store %arg11[%c0_51, %c0_52], %92 {strides = array<i32>} : memref<72x256xf32, #tpu.memory_space<vmem>>, vector<8x256xf32>,
    %c0_53 = arith.constant 0 : index
    %c112_54 = arith.constant 112 : index
    %94 = vector.load %arg9[%c0_53, %c112_54] : memref<8x512xf32, #tpu.memory_space<vmem>>, vector<8x256xf32>
    %cst_55 = arith.constant 0.000000e+00 : f32
    %95 = vector.shape_cast %3 : vector<1x256xi1> to vector<1x256xi1>
    %96 = vector.broadcast %95 : vector<1x256xi1> to vector<8x256xi1>
    %97 = vector.broadcast %cst_55 : f32 to vector<8x256xf32>
    %98 = arith.select %96, %94, %97 : vector<8x256xi1>, vector<8x256xf32>
    %c8 = arith.constant 8 : index
    %c0_56 = arith.constant 0 : index
    %99 = vector.load %arg11[%c8, %c0_56] : memref<72x256xf32, #tpu.memory_space<vmem>>, vector<8x256xf32>
    tpu.vector_store %arg11[%c8, %c0_56], %98 {strides = array<i32>} : memref<72x256xf32, #tpu.memory_space<vmem>>, vector<8x256xf32>,
    %c0_57 = arith.constant 0 : index
    %c113_58 = arith.constant 113 : index
    %100 = vector.load %arg9[%c0_57, %c113_58] : memref<8x512xf32, #tpu.memory_space<vmem>>, vector<8x256xf32>
    %101 = arith.andi %3, %9 : vector<1x256xi1>
    %cst_59 = arith.constant 0.000000e+00 : f32
    %102 = vector.shape_cast %101 : vector<1x256xi1> to vector<1x256xi1>
    %103 = vector.broadcast %102 : vector<1x256xi1> to vector<8x256xi1>
    %104 = vector.broadcast %cst_59 : f32 to vector<8x256xf32>
    %105 = arith.select %103, %100, %104 : vector<8x256xi1>, vector<8x256xf32>
    %c16_60 = arith.constant 16 : index
    %c0_61 = arith.constant 0 : index
    %106 = vector.load %arg11[%c16_60, %c0_61] : memref<72x256xf32, #tpu.memory_space<vmem>>, vector<8x256xf32>
    tpu.vector_store %arg11[%c16_60, %c0_61], %105 {strides = array<i32>} : memref<72x256xf32, #tpu.memory_space<vmem>>, vector<8x256xf32>,
    %c0_62 = arith.constant 0 : index
    %c127_63 = arith.constant 127 : index
    %107 = vector.load %arg9[%c0_62, %c127_63] : memref<8x512xf32, #tpu.memory_space<vmem>>, vector<8x256xf32>
    %cst_64 = arith.constant 0.000000e+00 : f32
    %108 = vector.shape_cast %7 : vector<1x256xi1> to vector<1x256xi1>
    %109 = vector.broadcast %108 : vector<1x256xi1> to vector<8x256xi1>
    %110 = vector.broadcast %cst_64 : f32 to vector<8x256xf32>
    %111 = arith.select %109, %107, %110 : vector<8x256xi1>, vector<8x256xf32>
    %c24 = arith.constant 24 : index
    %c0_65 = arith.constant 0 : index
    %112 = vector.load %arg11[%c24, %c0_65] : memref<72x256xf32, #tpu.memory_space<vmem>>, vector<8x256xf32>
    tpu.vector_store %arg11[%c24, %c0_65], %111 {strides = array<i32>} : memref<72x256xf32, #tpu.memory_space<vmem>>, vector<8x256xf32>,
    %c0_66 = arith.constant 0 : index
    %c128_67 = arith.constant 128 : index
    %113 = vector.load %arg9[%c0_66, %c128_67] : memref<8x512xf32, #tpu.memory_space<vmem>>, vector<8x256xf32>
    %c32_68 = arith.constant 32 : index
    %c0_69 = arith.constant 0 : index
    %114 = vector.load %arg11[%c32_68, %c0_69] : memref<72x256xf32, #tpu.memory_space<vmem>>, vector<8x256xf32>
    tpu.vector_store %arg11[%c32_68, %c0_69], %113 {strides = array<i32>} : memref<72x256xf32, #tpu.memory_space<vmem>>, vector<8x256xf32>,
    %c0_70 = arith.constant 0 : index
    %c129_71 = arith.constant 129 : index
    %115 = vector.load %arg9[%c0_70, %c129_71] : memref<8x512xf32, #tpu.memory_space<vmem>>, vector<8x256xf32>
    %cst_72 = arith.constant 0.000000e+00 : f32
    %116 = vector.shape_cast %9 : vector<1x256xi1> to vector<1x256xi1>
    %117 = vector.broadcast %116 : vector<1x256xi1> to vector<8x256xi1>
    %118 = vector.broadcast %cst_72 : f32 to vector<8x256xf32>
    %119 = arith.select %117, %115, %118 : vector<8x256xi1>, vector<8x256xf32>
    %c40 = arith.constant 40 : index
    %c0_73 = arith.constant 0 : index
    %120 = vector.load %arg11[%c40, %c0_73] : memref<72x256xf32, #tpu.memory_space<vmem>>, vector<8x256xf32>
    tpu.vector_store %arg11[%c40, %c0_73], %119 {strides = array<i32>} : memref<72x256xf32, #tpu.memory_space<vmem>>, vector<8x256xf32>,
    %c0_74 = arith.constant 0 : index
    %c143_75 = arith.constant 143 : index
    %121 = vector.load %arg9[%c0_74, %c143_75] : memref<8x512xf32, #tpu.memory_space<vmem>>, vector<8x256xf32>
    %122 = arith.andi %5, %7 : vector<1x256xi1>
    %cst_76 = arith.constant 0.000000e+00 : f32
    %123 = vector.shape_cast %122 : vector<1x256xi1> to vector<1x256xi1>
    %124 = vector.broadcast %123 : vector<1x256xi1> to vector<8x256xi1>
    %125 = vector.broadcast %cst_76 : f32 to vector<8x256xf32>
    %126 = arith.select %124, %121, %125 : vector<8x256xi1>, vector<8x256xf32>
    %c48_77 = arith.constant 48 : index
    %c0_78 = arith.constant 0 : index
    %127 = vector.load %arg11[%c48_77, %c0_78] : memref<72x256xf32, #tpu.memory_space<vmem>>, vector<8x256xf32>
    tpu.vector_store %arg11[%c48_77, %c0_78], %126 {strides = array<i32>} : memref<72x256xf32, #tpu.memory_space<vmem>>, vector<8x256xf32>,
    %c0_79 = arith.constant 0 : index
    %c144_80 = arith.constant 144 : index
    %128 = vector.load %arg9[%c0_79, %c144_80] : memref<8x512xf32, #tpu.memory_space<vmem>>, vector<8x256xf32>
    %cst_81 = arith.constant 0.000000e+00 : f32
    %129 = vector.shape_cast %5 : vector<1x256xi1> to vector<1x256xi1>
    %130 = vector.broadcast %129 : vector<1x256xi1> to vector<8x256xi1>
    %131 = vector.broadcast %cst_81 : f32 to vector<8x256xf32>
    %132 = arith.select %130, %128, %131 : vector<8x256xi1>, vector<8x256xf32>
    %c56 = arith.constant 56 : index
    %c0_82 = arith.constant 0 : index
    %133 = vector.load %arg11[%c56, %c0_82] : memref<72x256xf32, #tpu.memory_space<vmem>>, vector<8x256xf32>
    tpu.vector_store %arg11[%c56, %c0_82], %132 {strides = array<i32>} : memref<72x256xf32, #tpu.memory_space<vmem>>, vector<8x256xf32>,
    %c0_83 = arith.constant 0 : index
    %c145_84 = arith.constant 145 : index
    %134 = vector.load %arg9[%c0_83, %c145_84] : memref<8x512xf32, #tpu.memory_space<vmem>>, vector<8x256xf32>
    %135 = arith.andi %5, %9 : vector<1x256xi1>
    %cst_85 = arith.constant 0.000000e+00 : f32
    %136 = vector.shape_cast %135 : vector<1x256xi1> to vector<1x256xi1>
    %137 = vector.broadcast %136 : vector<1x256xi1> to vector<8x256xi1>
    %138 = vector.broadcast %cst_85 : f32 to vector<8x256xf32>
    %139 = arith.select %137, %134, %138 : vector<8x256xi1>, vector<8x256xf32>
    %c64_86 = arith.constant 64 : index
    %c0_87 = arith.constant 0 : index
    %140 = vector.load %arg11[%c64_86, %c0_87] : memref<72x256xf32, #tpu.memory_space<vmem>>, vector<8x256xf32>
    tpu.vector_store %arg11[%c64_86, %c0_87], %139 {strides = array<i32>} : memref<72x256xf32, #tpu.memory_space<vmem>>, vector<8x256xf32>,
    %c0_88 = arith.constant 0 : index
    %c0_89 = arith.constant 0 : index
    %141 = vector.load %arg11[%c0_88, %c0_89] : memref<72x256xf32, #tpu.memory_space<vmem>>, vector<72x256xf32>
    %142 = arith.truncf %141 : vector<72x256xf32> to vector<72x256xbf16>
    %cst_90 = arith.constant dense<0.000000e+00> : vector<8x256xf32>
    %143 = tpu.matmul %12, %142, %cst_90 {dimension_numbers = #tpu.dot_dimension_numbers<[1], [0], [0], [1], [0, 0, 1, 1], [], []>} : vector<8x72xbf16>, vector<72x256xbf16>, vector<8x256xf32> -> vector<8x256xf32>
    %144 = vector.broadcast %13 : vector<8x1xf32> to vector<8x256xf32>
    %145 = arith.addf %143, %144 : vector<8x256xf32>
    %146 = math.tanh %145 : vector<8x256xf32>
    %c0_91 = arith.constant 0 : index
    %c0_92 = arith.constant 0 : index
    %c0_93 = arith.constant 0 : index
    %147 = vector.load %arg7[%c0_91, %c0_92, %c0_93] : memref<1x8x256xf32, #tpu.memory_space<vmem>>, vector<1x8x256xf32>
    %148 = vector.shape_cast %147 : vector<1x8x256xf32> to vector<8x256xf32>
    %149 = vector.shape_cast %146 : vector<8x256xf32> to vector<1x8x256xf32>
    tpu.vector_store %arg7[%c0_91, %c0_92, %c0_93], %149 {strides = array<i32>} : memref<1x8x256xf32, #tpu.memory_space<vmem>>, vector<1x8x256xf32>,
    return
  }
  func.func @transform_0(%arg0: i32) -> (i32, i32, i32) {
    %c0_i32 = arith.constant 0 : i32
    %c0_i32_0 = arith.constant 0 : i32
    %c0_i32_1 = arith.constant 0 : i32
    return %arg0, %c0_i32, %c0_i32_0 : i32, i32, i32
  }
  func.func @transform_1(%arg0: i32) -> (i32, i32) {
    %c0_i32 = arith.constant 0 : i32
    %c0_i32_0 = arith.constant 0 : i32
    %c0_i32_1 = arith.constant 0 : i32
    return %c0_i32, %c0_i32_0 : i32, i32
  }
  func.func @transform_2(%arg0: i32) -> (i32, i32) {
    %c0_i32 = arith.constant 0 : i32
    %c0_i32_0 = arith.constant 0 : i32
    %c0_i32_1 = arith.constant 0 : i32
    return %c0_i32, %c0_i32_0 : i32, i32
  }
  func.func @transform_3(%arg0: i32) -> (i32, i32) {
    %c0_i32 = arith.constant 0 : i32
    %c0_i32_0 = arith.constant 0 : i32
    %c0_i32_1 = arith.constant 0 : i32
    return %c0_i32, %c0_i32_0 : i32, i32
  }
  func.func @transform_4(%arg0: i32) -> (i32, i32) {
    %c0_i32 = arith.constant 0 : i32
    %c0_i32_0 = arith.constant 0 : i32
    %c0_i32_1 = arith.constant 0 : i32
    return %c0_i32, %c0_i32_0 : i32, i32
  }
  func.func @transform_5(%arg0: i32) -> (i32, i32) {
    %c0_i32 = arith.constant 0 : i32
    %c0_i32_0 = arith.constant 0 : i32
    %c0_i32_1 = arith.constant 0 : i32
    return %c0_i32, %c0_i32_0 : i32, i32
  }
  func.func @transform_6(%arg0: i32) -> (i32, i32, i32) {
    %c0_i32 = arith.constant 0 : i32
    %c0_i32_0 = arith.constant 0 : i32
    %c0_i32_1 = arith.constant 0 : i32
    return %arg0, %c0_i32, %c0_i32_0 : i32, i32, i32
  }
}

</mosaic_0001>

<bundles_post_ra>
// kernel: up_forward.1
= control target key start
LH: loop header
LB: loop body
LE: loop exit
PB: predicated region body
PF: predicated region fallthrough
CT: control target
= control target key end

     0   :  { %s1660_s21 = smov 0   ;;  %s2011_s0 = inlined_call_operand.vmem [shape: f32[2,16,256], index: 0, kind: input, shape index: {}]   ;;  %s2012_s1 = inlined_call_operand.vmem [shape: bf16[8,144], index: 1, kind: input, shape index: {}]   ;;  %s2013_s2 = inlined_call_operand.vmem [shape: f32[8,1], index: 2, kind: input, shape index: {}]   ;;  %s2014_s3 = inlined_call_operand.vmem [shape: bf16[8,72], index: 3, kind: input, shape index: {}]   ;;  %s2015_s4 = inlined_call_operand.vmem [shape: f32[8,1], index: 4, kind: input, shape index: {}]   ;;  %s2016_s5 = inlined_call_operand.vmem [shape: s32[1,256], index: 5, kind: input, shape index: {}]   ;;  %s2017_s6 = inlined_call_operand.vmem [shape: f32[2,8,256], index: 6, kind: output, shape index: {}]  }
   0x1 LB: > { %s1266_s22 = sadd.s32 4294967295, %s1613_s21   ;;  %p1270_p0 = scmp.ge.s32.totalorder %s1613_s21, 1  ;;  %s1613_s21 = sphi %s1660_s21, %s16_s21  }
   0x2   : > { %p212_p1 = scmp.lt.s32.totalorder %s1613_s21, 3 }
   0x4   : > { %p213_p2 = pnand %p1270_p0, %p212_p1 }
   0x5   : > { %p242_p3 = scmp.lt.s32.totalorder (!%p213_p2), %s1266_s22, 1  ;;  %s1616_s27 = smov (!%p213_p2), 112  }
   0x6   : > { %216 = sbr.rel (%p213_p2) target bundleno = 743 (0x2e7), region = 44  ;;  %s1617_s28 = smov (!%p213_p2), 113  }
   0x7   : > { %s1618_s29 = smov (!%p213_p2), 127   ;;  %s1619_s30 = smov (!%p213_p2), 1  }
   0x8   : > { %s1620_s7 = smov (!%p213_p2), 15   ;;  %s1621_s8 = smov (!%p213_p2), 16  }
   0x9   : > { %s1622_s9 = smov (!%p213_p2), 17   ;;  %s1623_s12 = smov (!%p213_p2), 111  }
   0xb   : > { %s2060_s22 = smov (!%p242_p3, %s1266_s22), 1  ;;  %v673_v0 = vld [vmem:[#allocation2 + $0x20] sm:$0xff]  ;;  %v1615_v1 = vmov 0   ;;  %v676_v2 = vld [vmem:[#allocation2 + $0x38] sm:$0xff]  ;;  %v482_v13 = vld [vmem:[#allocation2 + $0x10] sm:$0xff]  ;;  %vm2027_vm0 = vcmask 130048   ;;  %v253_v20 = vlaneseq }
   0xc   : > { %s1318_s23 = sshll.u32 %s2060_s22, 5  ;;  %1560 = vset.pattern.permute.xlu0 %v1615_v1  ;;  %1198 = vmatprep.mubr.bf16.mxu1 %v1615_v1  ;;  %v485_v14 = vld [vmem:[#allocation2] sm:$0xff]  ;;  %vm2019_vm7 = vcmask 916480   ;;  %vm2020_vm8 = vcmask 924672   ;;  %vm2022_vm12 = vcmask 1039360  }
   0xd   : > { %s246_s26 = scalar_lea.vmem %s2011_s0, %s1318_s23  ;;  %v1495_v16 = vpack.i.bf16 %v485_v14, %v482_v13  ;;  %v1719_v17 = vld [vmem:[%s2012_s1] sm:$0xff]  ;;  %v283_v22 = vshrl.u32 %v253_v20, 7  ;;  %v1734_v23 = vand.u32 127, %v253_v20  ;;  %s1319_s23 = sshll.u32 %s2060_s22, 4 }
   0xe   : > { %v1676_v3 = vld [vmem:[%s246_s26 + $0x8] sm:$0xff]  ;;  %v1678_v4 = vld [vmem:[%s246_s26] sm:$0xff]  ;;  %v1680_v5 = vld [vmem:[%s246_s26 + $0x10] sm:$0xff]  ;;  %v1294_v18 = vcombine.high %v1719_v17, %v1719_v17 }
   0xf   : > { %v1440_v6 = vpack.i.bf16 %v673_v0, %v1676_v3  ;;  %v1450_v7 = vpack.i.bf16 %v1680_v5, %v1678_v4  ;;  %v1685_v8 = vld [vmem:[%s246_s26 + $0x18] sm:$0xff]  ;;  %v1346_v11 = vpack.c.bf16 %v1680_v5, %v1678_v4  ;;  %v1485_v12 = vpack.i.bf16 %v1676_v3, %v1678_v4  ;;  %v264_v19 = vld [vmem:[%s2013_s2] sm:$0xff]  ;;  %s251_s26 = scalar_lea.vmem %s2017_s6, %s1319_s23 }
  0x10   : > { %v1445_v9 = vpack.i.bf16 %v676_v2, %v1685_v8  ;;  %v1347_v10 = vpack.c.bf16 %v1685_v8, %v1676_v3  ;;  %v1490_v15 = vpack.i.bf16 %v1685_v8, %v1680_v5  ;;  %1313 = vmatprep.mubr.msk.bf16.mxu0 %vm2027_vm0, %v1294_v18  ;;  %v256_v21 = vld [vmem:[%s2016_s5] sm:$0x3]  ;;  %v288_v24 = vsub.s32 1, %v283_v22 }
  0x11   : > { %1441 = vrot.lane.b32.xlu0 %v1440_v6, %s1616_s27  ;;  %1451 = vrot.lane.b32.xlu1 %v1450_v7, %s1616_s27  ;;  %vm261_vm1 = vcmp.ge.s32.totalorder %v256_v21, 1  ;;  %v1737_v26 = vsub.s32 0, %v283_v22  ;;  %v1740_v27 = vadd.s32 128, %v1734_v23  ;;  %vm262_vm6 = vcmp.le.s32.totalorder %v256_v21, 14 }
  0x12   : > { %v281_v25 = vsel %vm261_vm1, 1, %v1615_v1  ;;  %v412_v37 = vsel %vm262_vm6, 1, %v1615_v1 }
  0x13   : > { %v1742_v28 = vrot.slane %v281_v25, %v288_v24  ;;  %v1745_v29 = vrot.slane %v281_v25, %v1737_v26  ;;  %vm260_vm2 = vcmp.lt.s32.totalorder %v1740_v27, 240  ;;  %v1763_v47 = vrot.slane %v412_v37, %v288_v24 }
  0x14   : > { %vm1356_vm9 = vmpackc.low %vm260_vm2, %vm260_vm2  ;;  %v1790_v13 = vrot.slane %v412_v37, %v1737_v26 }
  0x15   : > { %1446 = vrot.lane.b32.xlu0 %v1445_v9, %s1616_s27  ;;  %1456 = vrot.lane.b32.xlu1 %v1440_v6, %s1617_s28  ;;  %vm291_vm3 = vcmp.ne.s32.totalorder %v1742_v28, 0  ;;  %vm290_vm5 = vcmp.ne.s32.totalorder %v1745_v29, 0  ;;  %vm2018_vm13 = vcmp.eq.s32.totalorder %v1763_v47, 1  ;;  %vm422_vm1 = vcmp.ne.s32.totalorder %v1763_v47, 0 }
  0x16   : > { %vm613_vm4 = vmand %vm260_vm2, %vm291_vm3  ;;  %v614_v33 = vsel %vm290_vm5, 1, %v1615_v1  ;;  %vm421_vm6 = vcmp.ne.s32.totalorder %v1790_v13, 0  ;;  %v426_v21 = vsel %vm422_vm1, 1, %v1615_v1 }
  0x17   : > { %v615_v32 = vsel %vm613_vm4, 1, %v1615_v1  ;;  %v619_v41 = vrot.slane %v614_v33, %v1737_v26  ;;  %vm2026_vm4 = vcmp.ge.s32.totalorder %v1734_v23, 16 }
  0x18   : > { %v623_v40 = vrot.slane %v615_v32, %v1737_v26  ;;  %v434_v32 = vrot.slane %v426_v21, %v1737_v26 }
  0x19   : > { %1461 = vrot.lane.b32.xlu0 %v1445_v9, %s1617_s28  ;;  %1466 = vrot.lane.b32.xlu1 %v1450_v7, %s1617_s28  ;;  %vm1774_vm11 = vcmp.eq.s32.totalorder %v619_v41, 1 }
  0x1a   : > { %vm1770_vm10 = vcmp.eq.s32.totalorder %v623_v40, 1  ;;  %vm1362_vm15 = vmpackc.low %vm1774_vm11, %vm1774_vm11 }
  0x1b   : > { %vm1359_vm14 = vmpackc.low %vm1770_vm10, %vm1770_vm10 }
  0x1d   : > { %1471 = vrot.lane.b32.xlu0 %v1440_v6, %s1618_s29  ;;  %1476 = vrot.lane.b32.xlu1 %v1445_v9, %s1618_s29 }
  0x21   : > { %1481 = vrot.lane.b32.xlu0 %v1450_v7, %s1618_s29  ;;  %1486 = vrot.lane.b32.xlu1 %v1485_v12, %s1619_s30 }
  0x25   : > { %1491 = vrot.lane.b32.xlu0 %v1490_v15, %s1619_s30  ;;  %1496 = vrot.lane.b32.xlu1 %v1495_v16, %s1619_s30 }
  0x29   : > { %1506 = vrot.lane.b32.xlu1 %v1490_v15, %s1620_s7  ;;  %1501 = vrot.lane.b32.xlu0 %v1485_v12, %s1620_s7 }
  0x2d   : > { %1511 = vrot.lane.b32.xlu0 %v1495_v16, %s1620_s7  ;;  %1516 = vrot.lane.b32.xlu1 %v1485_v12, %s1621_s8 }
  0x31   : > { %1521 = vrot.lane.b32.xlu0 %v1490_v15, %s1621_s8  ;;  %1526 = vrot.lane.b32.xlu1 %v1495_v16, %s1621_s8 }
  0x35   : > { %1536 = vrot.lane.b32.xlu1 %v1490_v15, %s1622_s9  ;;  %1531 = vrot.lane.b32.xlu0 %v1485_v12, %s1622_s9 }
  0x39   : > { %1546 = vrot.lane.b32.xlu1 %v1440_v6, %s1623_s12  ;;  %1541 = vrot.lane.b32.xlu0 %v1495_v16, %s1622_s9 }
  0x3d   : > { %1556 = vrot.lane.b32.xlu1 %v1450_v7, %s1623_s12  ;;  %1551 = vrot.lane.b32.xlu0 %v1445_v9, %s1623_s12 }
  0x41   : > { %811 = vperm.xlu0 %1560, %v264_v19  }
  0x83   : > { %v1442_v30 = vpop.permute.xlu0 %1441  ;;  %v1452_v31 = vpop.permute.xlu1 %1451 }
  0x84   : > { %v1444_v34 = vunpack.i.h.bf16 %v1442_v30  ;;  %v1443_v35 = vunpack.i.l.bf16 %v1442_v30  ;;  %v1453_v36 = vunpack.i.l.bf16 %v1452_v31  ;;  %v1454_v42 = vunpack.i.h.bf16 %v1452_v31 }
  0x86   : > { %v701_v45 = vsel %vm2019_vm7, %v1443_v35, %v1444_v34  ;;  %v700_v46 = vsel %vm2019_vm7, %v1453_v36, %v1443_v35 }
  0x87   : > { %v1447_v38 = vpop.permute.xlu0 %1446  ;;  %v1457_v39 = vpop.permute.xlu1 %1456 }
  0x88   : > { %v1449_v43 = vunpack.i.h.bf16 %v1447_v38  ;;  %v1448_v44 = vunpack.i.l.bf16 %v1447_v38  ;;  %v1459_v48 = vunpack.i.h.bf16 %v1457_v39  ;;  %v1458_v49 = vunpack.i.l.bf16 %v1457_v39 }
  0x8a   : > { %v703_v50 = vsel %vm2019_vm7, %v1448_v44, %v1449_v43  ;;  %v702_v51 = vsel %vm2019_vm7, %v1454_v42, %v1448_v44  ;;  %v646_v62 = vsel %vm2020_vm8, %v1458_v49, %v1459_v48  ;;  %vm2025_vm7 = vcmask 7168  }
  0x8b   : > { %v1462_v52 = vpop.permute.xlu0 %1461  ;;  %v1467_v53 = vpop.permute.xlu1 %1466  ;;  %v1357_v54 = vpack.c.bf16 %v703_v50, %v701_v45  ;;  %v1352_v55 = vpack.c.bf16 %v702_v51, %v700_v46 }
  0x8c   : > { %v1464_v58 = vunpack.i.h.bf16 %v1462_v52  ;;  %v1463_v59 = vunpack.i.l.bf16 %v1462_v52  ;;  %v1469_v60 = vunpack.i.h.bf16 %v1467_v53  ;;  %v1468_v61 = vunpack.i.l.bf16 %v1467_v53 }
  0x8d   : > { %1358 = vmatprep.subr.msk.bf16.mxu0 %vm1356_vm9, %v1357_v54  ;;  %vm1365_vm9 = vmpackc.low %vm2018_vm13, %vm2018_vm13 }
  0x8e   : > { %v648_v63 = vsel %vm2020_vm8, %v1463_v59, %v1464_v58  ;;  %v647_v0 = vsel %vm2020_vm8, %v1469_v60, %v1463_v59  ;;  %v645_v2 = vsel %vm2020_vm8, %v1468_v61, %v1458_v49  ;;  %914 = vmatpush1.bf16.msra.mxu0 %v1352_v55  ;;  %vm2023_vm8 = vcmp.eq.s32.totalorder %v1742_v28, 1 }
  0x8f   : > { %v1360_v6 = vpack.c.bf16 %v648_v63, %v646_v62  ;;  %v1363_v7 = vpack.c.bf16 %v647_v0, %v645_v2  ;;  %v1472_v9 = vpop.permute.xlu0 %1471  ;;  %v1477_v12 = vpop.permute.xlu1 %1476  ;;  %v295_v60 = vsel %vm291_vm3, 1, %v1615_v1 }
  0x90   : > { %v1474_v14 = vunpack.i.h.bf16 %v1472_v9  ;;  %v1473_v15 = vunpack.i.l.bf16 %v1472_v9  ;;  %v1479_v16 = vunpack.i.h.bf16 %v1477_v12  ;;  %v1478_v18 = vunpack.i.l.bf16 %v1477_v12 }
  0x91   : > { %1361 = vmatprep.subr.msk.bf16.mxu0 %vm1359_vm14, %v1360_v6  ;;  %vm2021_vm14 = vcmp.eq.s32.totalorder %v1790_v13, 1  ;;  %v303_v2 = vrot.slane %v295_v60, %v1737_v26 }
  0x92   : > { %v581_v19 = vsel %vm2022_vm12, %v1473_v15, %v1474_v14  ;;  %v583_v20 = vsel %vm2022_vm12, %v1478_v18, %v1479_v16  ;;  %1364 = vmatpush1.bf16.msk.msra.mxu0 %vm1362_vm15, %v1363_v7  ;;  %vm423_vm15 = vmand %vm2026_vm4, %vm421_vm6 }
  0x93   : > { %v1366_v22 = vpack.c.bf16 %v583_v20, %v581_v19  ;;  %v1482_v24 = vpop.permute.xlu0 %1481  ;;  %v1487_v25 = vpop.permute.xlu1 %1486  ;;  %vm1368_vm13 = vmpackc.low %vm2021_vm14, %vm2021_vm14  ;;  %v425_v40 = vsel %vm423_vm15, 1, %v1615_v1  ;;  %vm2024_vm14 = vcmp.eq.s32.totalorder %v1745_v29, 1 }
  0x94   : > { %v1484_v30 = vunpack.i.h.bf16 %v1482_v24  ;;  %v1483_v31 = vunpack.i.l.bf16 %v1482_v24  ;;  %v1489_v35 = vunpack.i.h.bf16 %v1487_v25  ;;  %v1488_v36 = vunpack.i.l.bf16 %v1487_v25  ;;  %vm1374_vm15 = vmpackc.low %vm2024_vm14, %vm2024_vm14 }
  0x95   : > { %1367 = vmatprep.subr.msk.bf16.mxu0 %vm1365_vm9, %v1366_v22  ;;  %vm455_vm9 = vcmask 121856   ;;  %v430_v3 = vrot.slane %v425_v40, %v1737_v26 }
  0x96   : > { %v582_v33 = vsel %vm2022_vm12, %v1484_v30, %v1478_v18  ;;  %v580_v34 = vsel %vm2022_vm12, %v1483_v31, %v1473_v15  ;;  %v510_v45 = vsel %vm2025_vm7, %v1488_v36, %v1489_v35  ;;  %vm1822_vm12 = vcmp.eq.s32.totalorder %v434_v32, 1 }
  0x97   : > { %v1369_v37 = vpack.c.bf16 %v582_v33, %v580_v34  ;;  %v1492_v38 = vpop.permute.xlu0 %1491  ;;  %v1497_v39 = vpop.permute.xlu1 %1496  ;;  %vm1377_vm14 = vmpackc.low %vm1822_vm12, %vm1822_vm12 }
  0x98   : > { %v1494_v41 = vunpack.i.h.bf16 %v1492_v38  ;;  %v1493_v42 = vunpack.i.l.bf16 %v1492_v38  ;;  %v1499_v43 = vunpack.i.h.bf16 %v1497_v39  ;;  %v1498_v44 = vunpack.i.l.bf16 %v1497_v39 }
  0x99   : > { %1370 = vmatpush1.bf16.msk.msra.mxu0 %vm1368_vm13, %v1369_v37  ;;  %vm1371_vm13 = vmpackc.low %vm2023_vm8, %vm2023_vm8  ;;  %v734_v39 = vsel %vm421_vm6, 1, %v1615_v1 }
  0x9a   : > { %v512_v46 = vsel %vm2025_vm7, %v1493_v42, %v1494_v41  ;;  %919 = vmatprep.subr.bf16.mxu0 %v1347_v10  ;;  %v511_v50 = vsel %vm2025_vm7, %v1499_v43, %v1493_v42  ;;  %v509_v51 = vsel %vm2025_vm7, %v1498_v44, %v1488_v36  ;;  %vm292_vm8 = vmand %vm2026_vm4, %vm290_vm5  ;;  %vm1850_vm7 = vcmp.eq.s32.totalorder %v430_v3, 1 }
  0x9b   : > { %v1372_v49 = vpack.c.bf16 %v512_v46, %v510_v45  ;;  %v1507_v52 = vpop.permute.xlu1 %1506  ;;  %v1502_v53 = vpop.permute.xlu0 %1501  ;;  %v1375_v4 = vpack.c.bf16 %v511_v50, %v509_v51  ;;  %v294_v6 = vsel %vm292_vm8, 1, %v1615_v1  ;;  %vm1380_vm3 = vmpackc.low %vm1850_vm7, %vm1850_vm7  ;;  %vm324_vm8 = vcmask 138240  }
  0x9c   : > { %v1509_v8 = vunpack.i.h.bf16 %v1507_v52  ;;  %v1508_v10 = vunpack.i.l.bf16 %v1507_v52  ;;  %v1504_v54 = vunpack.i.h.bf16 %v1502_v53  ;;  %v1503_v55 = vunpack.i.l.bf16 %v1502_v53  ;;  %vm733_vm5 = vmand %vm260_vm2, %vm422_vm1 }
  0x9d   : > { %920 = vmatpush1.bf16.msra.mxu0 %v1346_v11  ;;  %v299_v25 = vrot.slane %v294_v6, %v1737_v26  ;;  %vm1383_vm1 = vmpackc.low %vm2026_vm4, %vm2026_vm4  ;;  %v735_v38 = vsel %vm733_vm5, 1, %v1615_v1  ;;  %v739_v52 = vrot.slane %v734_v39, %v1737_v26 }
  0x9e   : > { %v459_v58 = vsel %vm455_vm9, %v1508_v10, %v1509_v8  ;;  %v457_v59 = vsel %vm455_vm9, %v1503_v55, %v1504_v54  ;;  %1373 = vmatprep.subr.msk.bf16.mxu0 %vm1371_vm13, %v1372_v49  ;;  %vm1865_vm13 = vcmp.eq.s32.totalorder %v303_v2, 1  ;;  %v743_v1 = vrot.slane %v735_v38, %v1737_v26 }
  0x9f   : > { %v1378_v5 = vpack.c.bf16 %v459_v58, %v457_v59  ;;  %v1512_v11 = vpop.permute.xlu0 %1511  ;;  %v1517_v61 = vpop.permute.xlu1 %1516 }
  0xa0   : > { %v1514_v63 = vunpack.i.h.bf16 %v1512_v11  ;;  %v1513_v0 = vunpack.i.l.bf16 %v1512_v11  ;;  %v1519_v12 = vunpack.i.h.bf16 %v1517_v61  ;;  %v1518_v14 = vunpack.i.l.bf16 %v1517_v61 }
  0xa1   : > { %1376 = vmatpush1.bf16.msk.msra.mxu0 %vm1374_vm15, %v1375_v4  ;;  %vm1886_vm15 = vcmp.eq.s32.totalorder %v299_v25, 1  ;;  %vm1897_vm5 = vcmp.eq.s32.totalorder %v743_v1, 1 }
  0xa2   : > { %v458_v7 = vsel %vm455_vm9, %v1514_v63, %v1508_v10  ;;  %v456_v9 = vsel %vm455_vm9, %v1513_v0, %v1503_v55  ;;  %1379 = vmatprep.subr.msk.bf16.mxu0 %vm1377_vm14, %v1378_v5  ;;  %v381_v32 = vsel %vm2027_vm0, %v1518_v14, %v1519_v12  ;;  %vm1386_vm14 = vmpackc.low %vm1865_vm13, %vm1865_vm13 }
  0xa3   : > { %v1381_v15 = vpack.c.bf16 %v458_v7, %v456_v9  ;;  %v1522_v16 = vpop.permute.xlu0 %1521  ;;  %v1527_v18 = vpop.permute.xlu1 %1526  ;;  %vm1389_vm6 = vmpackc.low %vm1886_vm15, %vm1886_vm15 }
  0xa4   : > { %v1524_v19 = vunpack.i.h.bf16 %v1522_v16  ;;  %v1523_v20 = vunpack.i.l.bf16 %v1522_v16  ;;  %v1529_v21 = vunpack.i.h.bf16 %v1527_v18  ;;  %v1528_v22 = vunpack.i.l.bf16 %v1527_v18  ;;  %v998_v16 = vld [vmem:[#allocation3] sm:$0xff] }
  0xa5   : > { %1382 = vmatpush1.bf16.msk.msra.mxu0 %vm1380_vm3, %v1381_v15  ;;  %vm764_vm3 = vcmask 908288   ;;  %v1104_v15 = vld [vmem:[#allocation3 + $0x10] sm:$0xff]  ;;  %1004 = vrot.lane.b32.xlu0 %v998_v16, %s1620_s7 }
  0xa6   : > { %v382_v30 = vsel %vm2027_vm0, %v1529_v21, %v1523_v20  ;;  %v380_v31 = vsel %vm2027_vm0, %v1528_v22, %v1518_v14  ;;  %v383_v33 = vsel %vm2027_vm0, %v1523_v20, %v1524_v19  ;;  %v1293_v14 = vcombine.low %v1719_v17, %v1719_v17  ;;  %1112 = vrot.lane.b32.xlu1 %v1104_v15, %s1623_s12 }
  0xa7   : > { %v1384_v34 = vpack.c.bf16 %v382_v30, %v380_v31  ;;  %v1537_v35 = vpop.permute.xlu1 %1536  ;;  %v1532_v36 = vpop.permute.xlu0 %1531  ;;  %v1341_v37 = vpack.c.bf16 %v383_v33, %v381_v32 }
  0xa8   : > { %v1539_v40 = vunpack.i.h.bf16 %v1537_v35  ;;  %v1538_v41 = vunpack.i.l.bf16 %v1537_v35  ;;  %v1534_v42 = vunpack.i.h.bf16 %v1532_v36  ;;  %v1533_v43 = vunpack.i.l.bf16 %v1532_v36 }
  0xa9   : > { %925 = vmatprep.subr.bf16.mxu0 %v1341_v37 }
  0xaa   : > { %v328_v44 = vsel %vm324_vm8, %v1538_v41, %v1539_v40  ;;  %v326_v45 = vsel %vm324_vm8, %v1533_v43, %v1534_v42  ;;  %1385 = vmatpush1.bf16.msk.msra.mxu0 %vm1383_vm1, %v1384_v34  ;;  %vm1901_vm1 = vcmp.eq.s32.totalorder %v739_v52, 1  ;;  %v266_v34 = vld [vmem:[%s2015_s4] sm:$0xff] }
  0xab   : > { %v1387_v46 = vpack.c.bf16 %v328_v44, %v326_v45  ;;  %v1547_v49 = vpop.permute.xlu1 %1546  ;;  %v1542_v50 = vpop.permute.xlu0 %1541  ;;  %vm1395_vm4 = vmpackc.low %vm1901_vm1, %vm1901_vm1 }
  0xac   : > { %v1544_v53 = vunpack.i.h.bf16 %v1542_v50  ;;  %v1543_v3 = vunpack.i.l.bf16 %v1542_v50  ;;  %v1549_v8 = vunpack.i.h.bf16 %v1547_v49  ;;  %v1548_v10 = vunpack.i.l.bf16 %v1547_v49 }
  0xad   : > { %1388 = vmatprep.subr.msk.bf16.mxu0 %vm1386_vm14, %v1387_v46  ;;  %vm1392_vm14 = vmpackc.low %vm1897_vm5, %vm1897_vm5 }
  0xae   : > { %v327_v54 = vsel %vm324_vm8, %v1544_v53, %v1538_v41  ;;  %v325_v55 = vsel %vm324_vm8, %v1543_v3, %v1533_v43  ;;  %v766_v0 = vsel %vm764_vm3, %v1548_v10, %v1549_v8 }
  0xaf   : > { %v1390_v58 = vpack.c.bf16 %v327_v54, %v325_v55  ;;  %v1557_v59 = vpop.permute.xlu1 %1556  ;;  %v1552_v60 = vpop.permute.xlu0 %1551 }
  0xb0   : > { %v1559_v5 = vunpack.i.h.bf16 %v1557_v59  ;;  %v1558_v11 = vunpack.i.l.bf16 %v1557_v59  ;;  %v1554_v61 = vunpack.i.h.bf16 %v1552_v60  ;;  %v1553_v63 = vunpack.i.l.bf16 %v1552_v60 }
  0xb1   : > { %1391 = vmatpush1.bf16.msk.msra.mxu0 %vm1389_vm6, %v1390_v58  ;;  %vm2044_vm6 = vcmask 924672  }
  0xb2   : > { %v765_v2 = vsel %vm764_vm3, %v1558_v11, %v1548_v10  ;;  %v767_v6 = vsel %vm764_vm3, %v1559_v5, %v1553_v63  ;;  %v768_v7 = vsel %vm764_vm3, %v1553_v63, %v1554_v61  ;;  %vm2048_vm0 = vmmov %vm2044_vm6 }
  0xb3   : > { %v1393_v9 = vpack.c.bf16 %v768_v7, %v766_v0  ;;  %v1396_v12 = vpack.c.bf16 %v767_v6, %v765_v2 }
  0xb5   : > { %1394 = vmatprep.subr.msk.bf16.mxu0 %vm1392_vm14, %v1393_v9  ;;  %vm2045_vm14 = vcmask 916480  }
  0xb6   : > { %1397 = vmatpush2.bf16.msk.msra.mxu0 %vm1395_vm4, %v1396_v12  ;;  %vm1159_vm4 = vcmask 1043456  }
  0xb9   : > { %946 = vmatmul.mubr.bf16.vlgmr.msra.gmra.mxu0 %v1293_v14 }
  0xbc   : > { %v812_v18 = vpop.permute.xlu0 %811 }
 0x117   : > { %v1946_v36 = vpop.permute.xlu0 %1004 }
 0x118   : > { %v1113_v35 = vpop.permute.xlu1 %1112 }
 0x179   : > { %v947_v19 = vpop.f32.mrf.mxu0 }
 0x17a   : > { %v948_v20 = vadd.f32 %v947_v19, %v812_v18 }
 0x17b   : > { %v949_v21 = vpop.f32.mrf.mxu0 }
 0x17c   : > { %v1919_v22 = vmax.f32 %v948_v20, 0.0  ;;  %v950_v25 = vadd.f32 %v949_v21, %v812_v18 }
 0x17d   : > { %v951_v30 = vpop.f32.mrf.mxu0 }
 0x17e   : > { %v1921_v31 = vmax.f32 %v950_v25, 0.0  ;;  %1088 = vrot.lane.b32.xlu1 %v1919_v22, %s1616_s27  ;;  %1068 = vrot.lane.b32.xlu0 %v1919_v22, %s1617_s28 }
 0x17f   : > { %v952_v17 = vpop.f32.mrf.mxu0 }
 0x180   : > { %v1566_v32 = vpack.i.bf16 %v1104_v15, %v1921_v31  ;;  %v1561_v33 = vpack.i.bf16 %v1921_v31, %v1919_v22 }
 0x182   : > { %1567 = vrot.lane.b32.xlu0 %v1566_v32, %s1617_s28  ;;  %1048 = vrot.lane.b32.xlu1 %v1919_v22, %s1618_s29 }
 0x186   : > { %1577 = vrot.lane.b32.xlu0 %v1566_v32, %s1618_s29  ;;  %1562 = vrot.lane.b32.xlu1 %v1561_v33, %s1623_s12 }
 0x18a   : > { %1572 = vrot.lane.b32.xlu1 %v1566_v32, %s1616_s27  ;;  %1582 = vrot.lane.b32.xlu0 %v1561_v33, %s1620_s7 }
 0x18e   : > { %1024 = vrot.lane.b32.xlu1 %v998_v16, %s1619_s30  ;;  %1592 = vrot.lane.b32.xlu0 %v1561_v33, %s1622_s9 }
 0x192   : > { %1587 = vrot.lane.b32.xlu1 %v1561_v33, %s1619_s30  ;;  %964 = vrot.lane.b32.xlu0 %v998_v16, %s1622_s9 }
 0x196   : > { %1597 = vrot.lane.b32.xlu1 %v1561_v33, %s1621_s8  ;;  %1152 = vperm.xlu0 %1560, %v266_v34  }
 0x19a   : > { %984 = vrot.lane.b32.xlu1 %v998_v16, %s1621_s8 }
 0x1f0   : > { %v1089_v37 = vpop.permute.xlu1 %1088  ;;  %v1069_v38 = vpop.permute.xlu0 %1068 }
 0x1f4   : > { %v1568_v39 = vpop.permute.xlu0 %1567  ;;  %v1049_v40 = vpop.permute.xlu1 %1048 }
 0x1f5   : > { %v1570_v45 = vunpack.i.h.bf16 %v1568_v39  ;;  %v1569_v46 = vunpack.i.l.bf16 %v1568_v39 }
 0x1f7   : > { %v1075_v60 = vsel %vm2044_vm6, %v1569_v46, %v1570_v45  ;;  %v1074_v0 = vsel %vm2048_vm0, %v1069_v38, %v1569_v46  ;;  %vm1624_vm6 = vmmov 1   ;;  %vm2051_vm0 = vcmp.eq.s32.totalorder %v1790_v13, 1 }
 0x1f8   : > { %v1578_v41 = vpop.permute.xlu0 %1577  ;;  %v1563_v42 = vpop.permute.xlu1 %1562 }
 0x1f9   : > { %v1565_v43 = vunpack.i.h.bf16 %v1563_v42  ;;  %v1564_v44 = vunpack.i.l.bf16 %v1563_v42  ;;  %v1580_v3 = vunpack.i.h.bf16 %v1578_v41  ;;  %v1579_v8 = vunpack.i.l.bf16 %v1578_v41 }
 0x1fb   : > { %v1115_v49 = vsel %vm764_vm3, %v1565_v43, %v1113_v35  ;;  %v1114_v50 = vsel %vm764_vm3, %v1564_v44, %v1565_v43  ;;  %vm1398_vm3 = vmpackc.low %vm260_vm2, %vm1770_vm10  ;;  %vm2050_vm10 = vcmp.eq.s32.totalorder %v1763_v47, 1 }
 0x1fc   : > { %v1573_v1 = vpop.permute.xlu1 %1572  ;;  %v1119_v52 = vsel %vm1897_vm5, %v1115_v49, 0.0  ;;  %v1118_v53 = vsel %vm1901_vm1, %v1114_v50, 0.0  ;;  %v1583_v55 = vpop.permute.xlu0 %1582  ;;  %vm2046_vm5 = vmmov %vm2045_vm14  ;;  %vm2047_vm1 = vcmask 1039360  }
 0x1fd   : > { %v1575_v10 = vunpack.i.h.bf16 %v1573_v1  ;;  %v1574_v54 = vunpack.i.l.bf16 %v1573_v1  ;;  %v1149_v58 = vpack.c.bf16 %v1119_v52, %v1119_v52  ;;  %v1148_v59 = vpack.c.bf16 %v1118_v53, %v1118_v53  ;;  %vm2049_vm2 = vmmov %vm2047_vm1 }
 0x1fe   : > { %v1055_v63 = vsel %vm2047_vm1, %v1579_v8, %v1580_v3  ;;  %v1054_v27 = vsel %vm2049_vm2, %v1049_v40, %v1579_v8  ;;  %v1585_v2 = vunpack.i.h.bf16 %v1583_v55  ;;  %v1584_v6 = vunpack.i.l.bf16 %v1583_v55 }
 0x1ff   : > { %v1095_v5 = vsel %vm2045_vm14, %v1574_v54, %v1575_v10  ;;  %v1094_v4 = vsel %vm2046_vm5, %v1089_v37, %v1574_v54  ;;  %1314 = vmatprep.subr.msk.bf16.mxu1 %vm1159_vm4, %v1149_v58  ;;  %v1161_v61 = vsel %vm1159_vm4, %v1148_v59, 0  ;;  %vm1401_vm14 = vmpackc.low %vm1624_vm6, %vm1774_vm11  ;;  %v1405_v7 = vpack.c.bf16 %v1055_v63, %v1921_v31 }
 0x200   : > { %v1399_v26 = vpack.c.bf16 %v1095_v5, %v1075_v60  ;;  %v1025_v11 = vpop.permute.xlu1 %1024  ;;  %1173 = vmatpush1.bf16.msra.mxu1 %v1161_v61  ;;  %v1402_v56 = vpack.c.bf16 %v1094_v4, %v1074_v0  ;;  %vm1404_vm4 = vmpackc.low %vm2050_vm10, %vm1624_vm6  ;;  %v1593_v9 = vpop.permute.xlu0 %1592  ;;  %v1408_v57 = vpack.c.bf16 %v1054_v27, %v1919_v22  ;;  %v1011_v16 = vsel %vm455_vm9, %v1584_v6, %v1585_v2 }
 0x201   : > { %vm1407_vm11 = vmpackc.low %vm2051_vm0, %vm1624_vm6  ;;  %v1595_v18 = vunpack.i.h.bf16 %v1593_v9  ;;  %v1594_v19 = vunpack.i.l.bf16 %v1593_v9  ;;  %vm2053_vm5 = vcmp.eq.s32.totalorder %v1742_v28, 1  ;;  %v1010_v13 = vsel %vm455_vm9, %v1946_v36, %v1584_v6 }
 0x202   : > { %1400 = vmatprep.subr.msk.bf16.mxu1 %vm1398_vm3, %v1399_v26  ;;  %vm2052_vm3 = vcmask 7168   ;;  %vm1410_vm1 = vmpackc.low %vm2053_vm5, %vm1822_vm12  ;;  %vm2055_vm2 = vcmp.eq.s32.totalorder %v1745_v29, 1  ;;  %vm2056_vm12 = vcmask 130048   ;;  %v265_v29 = vld [vmem:[%s2014_s3] sm:$0xf] }
 0x203   : > { %vm1413_vm10 = vmpackc.low %vm2055_vm2, %vm1850_vm7  ;;  %v971_v28 = vsel %vm324_vm8, %v1594_v19, %v1595_v18  ;;  %vm2058_vm7 = vcmp.ge.s32.totalorder %v1734_v23, 16 }
 0x204   : > { %v1588_v12 = vpop.permute.xlu1 %1587  ;;  %1403 = vmatpush1.bf16.msk.msra.mxu1 %vm1401_vm14, %v1402_v56  ;;  %vm2054_vm14 = vmmov %vm2052_vm3  ;;  %v965_v31 = vpop.permute.xlu0 %964 }
 0x205   : > { %v1590_v14 = vunpack.i.h.bf16 %v1588_v12  ;;  %v1589_v15 = vunpack.i.l.bf16 %v1588_v12  ;;  %1406 = vmatprep.subr.msk.bf16.mxu1 %vm1404_vm4, %v1405_v7  ;;  %vm1416_vm4 = vmpackc.low %vm1624_vm6, %vm1865_vm13  ;;  %v970_v34 = vsel %vm324_vm8, %v965_v31, %v1594_v19  ;;  %vm1155_vm13 = vcmask 588800  }
 0x206   : > { %vm2057_vm9 = vmmov %vm2056_vm12 }
 0x207   : > { %v1031_v47 = vsel %vm2052_vm3, %v1589_v15, %v1590_v14  ;;  %v1030_v20 = vsel %vm2054_vm14, %v1025_v11, %v1589_v15  ;;  %vm1419_vm0 = vmpackc.low %vm2058_vm7, %vm1886_vm15 }
 0x208   : > { %v1411_v21 = vpack.c.bf16 %v1031_v47, %v1011_v16  ;;  %v1598_v22 = vpop.permute.xlu1 %1597  ;;  %1409 = vmatpush1.bf16.msk.msra.mxu1 %vm1407_vm11, %v1408_v57  ;;  %v1414_v48 = vpack.c.bf16 %v1030_v20, %v1010_v13 }
 0x209   : > { %v1600_v25 = vunpack.i.h.bf16 %v1598_v22  ;;  %v1599_v30 = vunpack.i.l.bf16 %v1598_v22 }
 0x20a   : > { %1412 = vmatprep.subr.msk.bf16.mxu1 %vm1410_vm1, %v1411_v21 }
 0x20b   : > { %v991_v17 = vsel %vm2056_vm12, %v1599_v30, %v1600_v25 }
 0x20c   : > { %v1417_v32 = vpack.c.bf16 %v991_v17, %v971_v28  ;;  %v985_v33 = vpop.permute.xlu1 %984  ;;  %1415 = vmatpush1.bf16.msk.msra.mxu1 %vm1413_vm10, %v1414_v48 }
 0x20d   : > { %v990_v35 = vsel %vm2057_vm9, %v985_v33, %v1599_v30 }
 0x20e   : > { %v1420_v62 = vpack.c.bf16 %v990_v35, %v970_v34  ;;  %1418 = vmatprep.subr.msk.bf16.mxu1 %vm1416_vm4, %v1417_v32 }
 0x210   : > { %1421 = vmatpush1.bf16.msk.msra.mxu1 %vm1419_vm0, %v1420_v62 }
 0x211   : > { %v1153_v24 = vpop.permute.xlu0 %1152 }
 0x213   : > { %1315 = vmatmul.mubr.msk.bf16.vlgmr.msra.gmra.mxu1 %vm1155_vm13, %v265_v29 }
 0x2d3   : > { %v1200_v36 = vpop.f32.mrf.mxu1 }
 0x2d4   : > { %v1201_v37 = vadd.f32 %v1200_v36, %v1153_v24 }
 0x2d5   : > { %v1202_v38 = vpop.f32.mrf.mxu1 }
 0x2d6   : > { %1603 = vtanh.f32 %v1201_v37  ;;  %v1203_v39 = vadd.f32 %v1202_v38, %v1153_v24 }
 0x2d7   : > { %v1204_v40 = vpop.f32.mrf.mxu1 }
 0x2d8   : > { %1605 = vtanh.f32 %v1203_v39 }
 0x2d9   : > { %v1205_v41 = vpop.f32.mrf.mxu1 }
 0x2e3   : > { %v1604_v23 = vpop.eup %1603 }
 0x2e4   : > { %1209 = vst [vmem:[%s251_s26] sm:$0xff] %v1604_v23 }
 0x2e5   : > { %v1606_v51 = vpop.eup %1605 }
 0x2e6   : > { %1210 = vst [vmem:[%s251_s26 + $0x8] sm:$0xff] %v1606_v51 }
 0x2e7 PF: > { %s16_s21 = sadd.s32 1, %s1613_s21  }
 0x2e8   : > { %p13_p4 = scmp.ge.s32.totalorder %s16_s21, 4  }
 0x2ea   :  { %15 = sbr.rel (!%p13_p4) target bundleno = 1 (0x1), region = 74 }

</bundles_post_ra>
